<compile_context>
chip_gen: v6e
topology: v6e:2x2x1
jax: 0.10.0
libtpu: 0.0.40
codegen_flags: <defaults>
</compile_context>

<pallas_src>
import math

import jax
import jax.numpy as jnp
from jax import lax
from jax.experimental import pallas as pl
from jax.experimental.pallas import tpu as pltpu


LANE = 128
TM_TARGET = 512          # A_hat row-tile target (power-of-two multiple of 128)
TK_TARGET = 512          # A_hat col-tile target; bump to 1024 on v5e to cut f32-acc RMW
VMEM_BUDGET = 40 << 20   # conservative across v5e/v6e/v7x scoped-VMEM limits
VMEM_LIMIT_CAP = 48 << 20


def _round_up(x, m):
    return ((x + m - 1) // m) * m


def _fused_vmem_bytes(tm, tk, f, h):
    """Rough live-set estimate for the fused layer kernel (2x double buffering)."""
    bf, f32 = 2, 4
    return (2 * tm * tk * bf            # (A+I) tile stream
            + 2 * tk * f * bf           # X k-block stream
            + 2 * f * h * bf            # resident W (budgeted as double-buffered)
            + 2 * tm * h * bf           # x0 row block
            + 2 * 2 * tm * h * bf       # two bf16 outputs
            + tm * h * f32              # f32 accumulator scratch
            + 2 * (tm + tk + h) * f32)  # D^{-1/2} scale vectors + bias


def _pick_tiles(n, f, h):
    """Tiles never collapse to 128 for awkward N: N is padded up to the tile size.
    Tiles are powers of two x 128, VMEM-budget aware, >=2 row tiles when possible."""
    n_lane = _round_up(n, LANE)
    tm, tk = TM_TARGET, TK_TARGET
    while tm // 2 >= n_lane and tm > LANE:
        tm //= 2
    while tk // 2 >= n_lane and tk > LANE:
        tk //= 2
    # VMEM-budget-aware shrink (v7x has 64 MiB physical / 32 MiB scoped default).
    while _fused_vmem_bytes(tm, tk, f, h) > VMEM_BUDGET and (tm > LANE or tk > LANE):
        if tk >= tm and tk > LANE:
            tk //= 2
        else:
            tm //= 2
    n_pad = _round_up(n_lane, max(tm, tk))
    # Keep >= 2 row tiles whenever possible so both v7x TensorCores get work.
    if n_pad // tm < 2 and tm > LANE:
        tm //= 2
    return n_pad, tm, tk


def _vmem_limit(tm, tk, f, h):
    est = int(_fused_vmem_bytes(tm, tk, f, h) * 1.3)
    return int(min(max(est, 32 << 20), VMEM_LIMIT_CAP))


# ----------------------------- Pallas kernels -------------------------------

def _residual_linear_kernel(x_ref, w_ref, b_ref, o_ref):
    # residual_fc:  X @ W + b   (row-tiled, f32 accumulate, bf16 out)
    acc = jnp.dot(x_ref[...], w_ref[...], preferred_element_type=jnp.float32)
    o_ref[...] = (acc + b_ref[...]).astype(o_ref.dtype)


def _gcn_layer_fused_kernel(x_ref, w_ref, a_ref, dk_ref, dm_ref, b_ref, x0_ref,
                            hnorm_ref, hout_ref, acc_ref):
    # Non-final layer, fully fused:
    #   acc += (A+I)[i,k] @ ((X[k] @ W) * d_k^{-1/2})        (two MXU dots per step)
    #   finalize: h = acc * d_i^{-1/2} + b; relu; L2-normalize; (+x0)
    k = pl.program_id(1)

    @pl.when(k == 0)
    def _():
        acc_ref[...] = jnp.zeros_like(acc_ref)

    xw = jnp.dot(x_ref[...], w_ref[...], preferred_element_type=jnp.float32)
    xw = (xw * dk_ref[...]).astype(jnp.bfloat16)          # column-side D^{-1/2} (f32)
    acc_ref[...] += jnp.dot(a_ref[...], xw, preferred_element_type=jnp.float32)

    @pl.when(k == pl.num_programs(1) - 1)
    def _():
        h = acc_ref[...] * dm_ref[...] + b_ref[...]        # row-side D^{-1/2} + bias (f32)
        h = jnp.maximum(h, 0.0)                            # relu
        ssq = jnp.sum(h * h, axis=-1, keepdims=True)       # row sum-of-squares (f32)
        # F.normalize (eps=1e-12): x / max(||x||, eps) == x * rsqrt(max(ssq, eps^2))
        h_n = h * lax.rsqrt(jnp.maximum(ssq, 1e-24))
        hnorm_ref[...] = h_n.astype(hnorm_ref.dtype)       # hs entry (pre-residual)
        hout_ref[...] = (h_n + x0_ref[...].astype(jnp.float32)).astype(hout_ref.dtype)


def _gcn_layer_final_kernel(x_ref, w_ref, a_ref, dk_ref, dm_ref, b_ref, o_ref, acc_ref):
    # Last layer: out = A_hat @ (X @ W) + b   (no activation / normalize / residual)
    k = pl.program_id(1)

    @pl.when(k == 0)
    def _():
        acc_ref[...] = jnp.zeros_like(acc_ref)

    xw = jnp.dot(x_ref[...], w_ref[...], preferred_element_type=jnp.float32)
    xw = (xw * dk_ref[...]).astype(jnp.bfloat16)
    acc_ref[...] += jnp.dot(a_ref[...], xw, preferred_element_type=jnp.float32)

    @pl.when(k == pl.num_programs(1) - 1)
    def _():
        o_ref[...] = (acc_ref[...] * dm_ref[...] + b_ref[...]).astype(o_ref.dtype)


# ----------------------------- kernel wrappers -------------------------------

def residual_linear(x, w, b, tm, out_dtype=jnp.bfloat16):
    n, f = x.shape
    h = w.shape[1]
    return pl.pallas_call(
        _residual_linear_kernel,
        out_shape=jax.ShapeDtypeStruct((n, h), out_dtype),
        grid_spec=pltpu.PrefetchScalarGridSpec(
            num_scalar_prefetch=0, grid=(n // tm,),
            in_specs=[pl.BlockSpec((tm, f), lambda i: (i, 0)),
                      pl.BlockSpec((f, h), lambda i: (0, 0)),
                      pl.BlockSpec((1, h), lambda i: (0, 0))],
            out_specs=pl.BlockSpec((tm, h), lambda i: (i, 0))),
        compiler_params=pltpu.CompilerParams(dimension_semantics=("parallel",)),
    )(x, w, b)


def gcn_layer_fused(x, w, a, d, b, x0, tm, tk):
    """One fused pallas_call for a non-final GNN layer."""
    n_pad, f = x.shape
    h = w.shape[1]
    shp = jax.ShapeDtypeStruct((n_pad, h), jnp.bfloat16)
    return pl.pallas_call(
        _gcn_layer_fused_kernel,
        out_shape=(shp, shp),
        grid_spec=pltpu.PrefetchScalarGridSpec(
            num_scalar_prefetch=0, grid=(n_pad // tm, n_pad // tk),
            in_specs=[pl.BlockSpec((tk, f), lambda i, k: (k, 0)),    # X k-block
                      pl.BlockSpec((f, h), lambda i, k: (0, 0)),     # resident W
                      pl.BlockSpec((tm, tk), lambda i, k: (i, k)),   # (A+I) 0/1 tile
                      pl.BlockSpec((tk, 1), lambda i, k: (k, 0)),    # d^{-1/2}, k side
                      pl.BlockSpec((tm, 1), lambda i, k: (i, 0)),    # d^{-1/2}, row side
                      pl.BlockSpec((1, h), lambda i, k: (0, 0)),     # bias
                      pl.BlockSpec((tm, h), lambda i, k: (i, 0))],   # x0 residual
            out_specs=(pl.BlockSpec((tm, h), lambda i, k: (i, 0)),
                       pl.BlockSpec((tm, h), lambda i, k: (i, 0))),
            scratch_shapes=[pltpu.VMEM((tm, h), jnp.float32)]),
        compiler_params=pltpu.CompilerParams(
            dimension_semantics=("parallel", "arbitrary"),
            vmem_limit_bytes=_vmem_limit(tm, tk, f, h)),
    )(x, w, a, d, d, b, x0)


def gcn_layer_final(x, w, a, d, b, tm, tk, out_dtype=jnp.float32):
    """One fused pallas_call for the last GNN layer (f32 logits out)."""
    n_pad, f = x.shape
    h = w.shape[1]
    return pl.pallas_call(
        _gcn_layer_final_kernel,
        out_shape=jax.ShapeDtypeStruct((n_pad, h), out_dtype),
        grid_spec=pltpu.PrefetchScalarGridSpec(
            num_scalar_prefetch=0, grid=(n_pad // tm, n_pad // tk),
            in_specs=[pl.BlockSpec((tk, f), lambda i, k: (k, 0)),
                      pl.BlockSpec((f, h), lambda i, k: (0, 0)),
                      pl.BlockSpec((tm, tk), lambda i, k: (i, k)),
                      pl.BlockSpec((tk, 1), lambda i, k: (k, 0)),
                      pl.BlockSpec((tm, 1), lambda i, k: (i, 0)),
                      pl.BlockSpec((1, h), lambda i, k: (0, 0))],
            out_specs=pl.BlockSpec((tm, h), lambda i, k: (i, 0)),
            scratch_shapes=[pltpu.VMEM((tm, h), jnp.float32)]),
        compiler_params=pltpu.CompilerParams(
            dimension_semantics=("parallel", "arbitrary"),
            vmem_limit_bytes=_vmem_limit(tm, tk, f, h)),
    )(x, w, a, d, d, b)


# ------------------------------- glue (JAX) ---------------------------------

def build_dense_adj(edge_index, num_nodes):
    """Dense 0/1 adjacency from edge_index (row = dst, col = src).
    Duplicate edges collapse to 1 (assumes coalesced edge_index)."""
    src, dst = edge_index[0], edge_index[1]
    a = jnp.zeros((num_nodes, num_nodes), jnp.float32)
    return a.at[dst, src].set(1.0)


def gcn_norm_factors(a_raw):
    """(A+I) with diagonal exactly 1 (no self-loop double counting) and D^{-1/2}."""
    n = a_raw.shape[0]
    eye = jnp.eye(n, dtype=bool)
    a_sl = jnp.where(eye, 1.0, a_raw)                       # exact 0/1 values
    deg = jnp.sum(a_sl, axis=1)
    d_inv_sqrt = jnp.where(deg > 0, lax.rsqrt(deg), 0.0)    # f32, never bf16'd
    return a_sl, d_inv_sqrt


def _glorot(key, shape):
    fan_in, fan_out = shape
    lim = jnp.sqrt(6.0 / (fan_in + fan_out))
    return jax.random.uniform(key, shape, jnp.float32, minval=-lim, maxval=lim)


def _pad2(x, rows, cols, dtype):
    out = jnp.zeros((rows, cols), dtype)
    return out.at[:x.shape[0], :x.shape[1]].set(x.astype(dtype))


class SSDPallas:
    """SSD forward pass (inference) built from Pallas TPU kernels."""

    def __init__(self, in_dim, hidden, out_dim, num_layers=3, key=jax.random.PRNGKey(0)):
        self.in_dim, self.hidden, self.out_dim = in_dim, hidden, out_dim
        self.f_pad = _round_up(in_dim, LANE)
        self.h_pad = _round_up(hidden, LANE)
        self.c_pad = _round_up(out_dim, LANE)

        keys = jax.random.split(key, num_layers + 1)
        dims = [in_dim] + [hidden] * (num_layers - 1) + [out_dim]
        pdims = [self.f_pad] + [self.h_pad] * (num_layers - 1) + [self.c_pad]

        self.layers = []
        for i in range(num_layers):
            w = _glorot(keys[i], (dims[i], dims[i + 1]))
            w_p = _pad2(w, pdims[i], pdims[i + 1], jnp.bfloat16)   # lane-padded MXU dtype
            b_p = jnp.zeros((1, pdims[i + 1]), jnp.float32)        # bias added in f32
            self.layers.append((w_p, b_p))

        # residual_fc: in_dim -> hidden (residual_type='add'); dropout == identity here
        w_res = _glorot(keys[-1], (in_dim, hidden))
        self.w_res = _pad2(w_res, self.f_pad, self.h_pad, jnp.bfloat16)
        self.b_res = jnp.zeros((1, self.h_pad), jnp.float32)

    def __call__(self, x, edge_index):
        log = {}
        n = x.shape[0]

        adj_raw = build_dense_adj(edge_index, n)           # returned (dense 0/1, f32)
        a_sl, d_inv_sqrt = gcn_norm_factors(adj_raw)

        f_max = max(self.f_pad, self.h_pad)
        h_max = max(self.h_pad, self.c_pad)
        n_pad, tm, tk = _pick_tiles(n, f_max, h_max)

        a_p = _pad2(a_sl, n_pad, n_pad, jnp.bfloat16)      # exact 0/1, cast+pad once
        d_p = jnp.zeros((n_pad, 1), jnp.float32).at[:n, 0].set(d_inv_sqrt)
        x_p = _pad2(x, n_pad, self.f_pad, jnp.bfloat16)

        # residual branch (one row-tiled pallas_call)
        x0 = residual_linear(x_p, self.w_res, self.b_res, tm)   # [n_pad, h_pad] bf16

        hs = []
        h = x_p
        out = None
        last = len(self.layers) - 1
        for i, (w, b) in enumerate(self.layers):
            if i == last:
                out = gcn_layer_final(h, w, a_p, d_p, b, tm, tk)        # f32 logits
                break
            # X@W + aggregation + relu + L2-normalize + residual, all in one call
            h_norm, h = gcn_layer_fused(h, w, a_p, d_p, b, x0, tm, tk)
            hs.append(h_norm[:n, :self.hidden])            # hs entry (pre-residual)

        return ([out[:n, :self.out_dim], hs, adj_raw], log)


# --------------------------------- main --------------------------------------

if __name__ == "__main__":
    key = jax.random.PRNGKey(0)
    k_x, k_e, k_p = jax.random.split(key, 3)

    N, F_IN, HIDDEN, CLASSES, E = 16, 8, 32, 4, 40

    x = jax.random.normal(k_x, (N, F_IN), dtype=jnp.float32)
    edge_index = jax.random.randint(k_e, (2, E), 0, N, dtype=jnp.int32)

    model = SSDPallas(F_IN, HIDDEN, CLASSES, num_layers=3, key=k_p)
    (out, hs, adj), log = model(x, edge_index)

    out = jax.block_until_ready(out)
    for h in hs:
        jax.block_until_ready(h)
    jax.block_until_ready(adj)

    assert out.shape == (N, CLASSES)
    assert len(hs) == 2 and hs[0].shape == (N, HIDDEN)
    assert adj.shape == (N, N)
    assert bool(jnp.all(jnp.isfinite(out)))

    print("KERNEL_OK")
</pallas_src>

<mosaic_0001>
module attributes {stable_mosaic.version = 11 : i64} {
  func.func @_residual_linear_kernel(%arg0: i32, %arg1: memref<128x128xbf16, #tpu.memory_space<vmem>>, %arg2: memref<128x128xbf16, #tpu.memory_space<vmem>>, %arg3: memref<1x128xf32, #tpu.memory_space<vmem>>, %arg4: memref<128x128xbf16, #tpu.memory_space<vmem>>) attributes {dimension_semantics = [#tpu.dimension_semantics<parallel>], iteration_bounds = array<i64: 1>, scalar_prefetch = 0 : i64, scratch_operands = 0 : i64, tpu.core_type = #tpu.core_type<tc>, window_params = [{transform_indices = @transform_0, window_bounds = array<i64: 128, 128>}, {pipeline_mode = #tpu.pipeline_mode<synchronous>, transform_indices = @transform_1, window_bounds = array<i64: 128, 128>}, {pipeline_mode = #tpu.pipeline_mode<synchronous>, transform_indices = @transform_2, window_bounds = array<i64: 1, 128>}, {transform_indices = @transform_3, window_bounds = array<i64: 128, 128>}]} {
    %c0 = arith.constant 0 : index
    %c0_0 = arith.constant 0 : index
    %0 = vector.load %arg1[%c0, %c0_0] : memref<128x128xbf16, #tpu.memory_space<vmem>>, vector<128x128xbf16>
    %c0_1 = arith.constant 0 : index
    %c0_2 = arith.constant 0 : index
    %1 = vector.load %arg2[%c0_1, %c0_2] : memref<128x128xbf16, #tpu.memory_space<vmem>>, vector<128x128xbf16>
    %cst = arith.constant dense<0.000000e+00> : vector<128x128xf32>
    %2 = tpu.matmul %0, %1, %cst {dimension_numbers = #tpu.dot_dimension_numbers<[1], [0], [0], [1], [0, 0, 1, 1], [], []>} : vector<128x128xbf16>, vector<128x128xbf16>, vector<128x128xf32> -> vector<128x128xf32>
    %c0_3 = arith.constant 0 : index
    %c0_4 = arith.constant 0 : index
    %3 = vector.load %arg3[%c0_3, %c0_4] : memref<1x128xf32, #tpu.memory_space<vmem>>, vector<1x128xf32>
    %4 = vector.broadcast %3 : vector<1x128xf32> to vector<128x128xf32>
    %5 = arith.addf %2, %4 : vector<128x128xf32>
    %6 = arith.truncf %5 : vector<128x128xf32> to vector<128x128xbf16>
    %c0_5 = arith.constant 0 : index
    %c0_6 = arith.constant 0 : index
    %7 = vector.load %arg4[%c0_5, %c0_6] : memref<128x128xbf16, #tpu.memory_space<vmem>>, vector<128x128xbf16>
    tpu.vector_store %arg4[%c0_5, %c0_6], %6 {strides = array<i32>} : memref<128x128xbf16, #tpu.memory_space<vmem>>, vector<128x128xbf16>,
    return
  }
  func.func @transform_0(%arg0: i32) -> (i32, i32) {
    %c0_i32 = arith.constant 0 : i32
    %c0_i32_0 = arith.constant 0 : i32
    return %arg0, %c0_i32 : i32, i32
  }
  func.func @transform_1(%arg0: i32) -> (i32, i32) {
    %c0_i32 = arith.constant 0 : i32
    %c0_i32_0 = arith.constant 0 : i32
    %c0_i32_1 = arith.constant 0 : i32
    return %c0_i32, %c0_i32_0 : i32, i32
  }
  func.func @transform_2(%arg0: i32) -> (i32, i32) {
    %c0_i32 = arith.constant 0 : i32
    %c0_i32_0 = arith.constant 0 : i32
    %c0_i32_1 = arith.constant 0 : i32
    return %c0_i32, %c0_i32_0 : i32, i32
  }
  func.func @transform_3(%arg0: i32) -> (i32, i32) {
    %c0_i32 = arith.constant 0 : i32
    %c0_i32_0 = arith.constant 0 : i32
    return %arg0, %c0_i32 : i32, i32
  }
}

</mosaic_0001>

<bundles_post_ra>
// kernel: tpu_custom_call.1
= control target key start
LH: loop header
LB: loop body
LE: loop exit
PB: predicated region body
PF: predicated region fallthrough
CT: control target
= control target key end

     0   :  { %8 = vsyncpa [#allocation3], 0  ;;  %s667_s0 = inlined_call_operand.hbm [shape: bf16[128,128], index: 0, kind: input, shape index: {}]   ;;  %s668_s1 = inlined_call_operand.hbm [shape: bf16[128,128], index: 1, kind: input, shape index: {}]   ;;  %s669_s2 = inlined_call_operand.vmem [shape: f32[1,128], index: 2, kind: input, shape index: {}]   ;;  %s670_s3 = inlined_call_operand.hbm [shape: bf16[128,128], index: 3, kind: output, shape index: {}]  }
   0x1   :  { %9 = vsyncpa [#allocation6], 0 }
   0x2   :  { %10 = vsyncpa [#allocation4], 0  ;;  %s621_s12 = smov [#allocation2]  }
   0x3   :  { %s16_s13 = sshll.u32 %s621_s12, 4  ;;  %s17_s13 = int_to_ptr.vmem [resolvable:$true] %s16_s13 }
   0x4   :  { %s563_s14 = scalar_lea.vmem %s17_s13, 1024  ;;  %p568_p1 = scmp.lt.s32.totalorder %s17_s13, %s17_s13 }
   0x5   :  { %p564_p0 = scmp.ne.s32.totalorder %s17_s13, %s563_s14  ;;  %p569_p2 = scmp.lt.s32.totalorder %s563_s14, %s563_s14 }
   0x7   :  { %p570_p3 = por %p569_p2, %p568_p1 }
   0x9   :  { %p571_p4 = pnand %p570_p3, %p564_p0 }
   0xb   :  { %574 = shalt.err (!%p571_p4)
}
   0xc   :  { %s622_s15 = smov 64   ;;  %s623_s16 = smov 4  }
   0xd   :  { %22 = dma.hbm_to_vmem [thread:$0]  %s667_s0, 1024, %s17_s13, [#allocation3], %s622_s15, %s622_s15, %s623_s16  }
   0xe   :  { %s624_s19 = smov [#allocation5]  }
   0xf   :  { %s28_s20 = sshll.u32 %s624_s19, 4  ;;  %s29_s20 = int_to_ptr.vmem [resolvable:$true] %s28_s20 }
  0x10   :  { %s583_s21 = scalar_lea.vmem %s29_s20, 1024  ;;  %p588_p6 = scmp.lt.s32.totalorder %s29_s20, %s29_s20 }
  0x11   :  { %p584_p5 = scmp.ne.s32.totalorder %s29_s20, %s583_s21  ;;  %p589_p7 = scmp.lt.s32.totalorder %s583_s21, %s583_s21 }
  0x13   :  { %p590_p8 = por %p589_p7, %p588_p6 }
  0x15   :  { %p591_p9 = pnand %p590_p8, %p584_p5 }
  0x17   :  { %594 = shalt.err (!%p591_p9)
}
  0x18   :  { %34 = dma.hbm_to_vmem [thread:$0]  %s668_s1, 1024, %s29_s20, [#allocation6], %s622_s15, %s622_s15, %s623_s16  }
  0x19   :  { %615 = dma.done.wait [#allocation3], 1024  }
  0x1a   :  { %616 = vsyncadd [#allocation3], 4294966272 }
  0x1b   :  { %617 = dma.done.wait [#allocation6], 1024  }
  0x1c   :  { %618 = vsyncadd [#allocation6], 4294966272  ;;  %v539_v0 = vld [vmem:[#allocation5 + $0x38] sm:$0xff]   ;;  %v540_v1 = vld [vmem:[#allocation5 + $0x30] sm:$0xff]  }
  0x1d   :  { %486 = vmatprep.subr.bf16.mxu0 %v539_v0  ;;  %518 = vmatprep.subr.bf16.mxu1 %v539_v0  ;;  %v541_v2 = vld [vmem:[#allocation5 + $0x28] sm:$0xff]   ;;  %v542_v3 = vld [vmem:[#allocation5 + $0x20] sm:$0xff]   ;;  %v543_v6 = vld [vmem:[#allocation5 + $0x18] sm:$0xff]  }
  0x1e   :  { %487 = vmatpush3.bf16.msra.mxu0 %v539_v0  ;;  %526 = vmatpush3.bf16.msra.mxu1 %v539_v0  ;;  %v547_v4 = vld [vmem:[#allocation2] sm:$0xff]   ;;  %v544_v7 = vld [vmem:[#allocation5 + $0x10] sm:$0xff]   ;;  %v545_v8 = vld [vmem:[#allocation5 + $0x8] sm:$0xff]  }
  0x1f   :  { %488 = vmatprep.subr.bf16.mxu0 %v540_v1  ;;  %519 = vmatprep.subr.bf16.mxu1 %v540_v1  ;;  %v548_v5 = vld [vmem:[#allocation2 + $0x20] sm:$0xff]   ;;  %v549_v10 = vld [vmem:[#allocation2 + $0x8] sm:$0xff]   ;;  %v551_v12 = vld [vmem:[#allocation2 + $0x10] sm:$0xff]  }
  0x20   :  { %502 = vmatprep.mubr.bf16.mxu0 %v547_v4  ;;  %510 = vmatprep.mubr.bf16.mxu1 %v548_v5  ;;  %v546_v9 = vld [vmem:[#allocation5] sm:$0xff]   ;;  %v550_v11 = vld [vmem:[#allocation2 + $0x28] sm:$0xff]   ;;  %v552_v13 = vld [vmem:[#allocation2 + $0x30] sm:$0xff]  }
  0x21   :  { %v553_v14 = vld [vmem:[#allocation2 + $0x18] sm:$0xff]   ;;  %v374_v18 = vld [vmem:[%s669_s2] ss:$0 sm:$0xff]  ;;  %s625_s2 = smov [#allocation7]  }
  0x22   :  { %489 = vmatpush3.bf16.msra.mxu0 %v540_v1  ;;  %527 = vmatpush3.bf16.msra.mxu1 %v540_v1  ;;  %v554_v15 = vld [vmem:[#allocation2 + $0x38] sm:$0xff]   ;;  %s361_s24 = sshll.u32 %s625_s2, 4  ;;  %s362_s24 = int_to_ptr.vmem [resolvable:$true] %s361_s24 }
  0x23   :  { %490 = vmatprep.subr.bf16.mxu0 %v541_v2  ;;  %520 = vmatprep.subr.bf16.mxu1 %v541_v2  ;;  %s595_s25 = scalar_lea.vmem %s362_s24, 1024  ;;  %p600_p11 = scmp.lt.s32.totalorder %s362_s24, %s362_s24 }
  0x24   :  { %p596_p10 = scmp.ne.s32.totalorder %s362_s24, %s595_s25  ;;  %p601_p12 = scmp.lt.s32.totalorder %s595_s25, %s595_s25 }
  0x26   :  { %491 = vmatpush3.bf16.msra.mxu0 %v541_v2  ;;  %528 = vmatpush3.bf16.msra.mxu1 %v541_v2  ;;  %p602_p13 = por %p601_p12, %p600_p11 }
  0x27   :  { %492 = vmatprep.subr.bf16.mxu0 %v542_v3  ;;  %521 = vmatprep.subr.bf16.mxu1 %v542_v3 }
  0x28   :  { %p603_p0 = pnand %p602_p13, %p596_p10 }
  0x2a   :  { %493 = vmatpush3.bf16.msra.mxu0 %v542_v3  ;;  %529 = vmatpush3.bf16.msra.mxu1 %v542_v3 }
  0x2b   :  { %494 = vmatprep.subr.bf16.mxu0 %v543_v6  ;;  %522 = vmatprep.subr.bf16.mxu1 %v543_v6 }
  0x2e   :  { %495 = vmatpush3.bf16.msra.mxu0 %v543_v6  ;;  %530 = vmatpush3.bf16.msra.mxu1 %v543_v6 }
  0x2f   :  { %496 = vmatprep.subr.bf16.mxu0 %v544_v7  ;;  %523 = vmatprep.subr.bf16.mxu1 %v544_v7 }
  0x32   :  { %497 = vmatpush3.bf16.msra.mxu0 %v544_v7  ;;  %531 = vmatpush3.bf16.msra.mxu1 %v544_v7 }
  0x33   :  { %498 = vmatprep.subr.bf16.mxu0 %v545_v8  ;;  %524 = vmatprep.subr.bf16.mxu1 %v545_v8 }
  0x36   :  { %499 = vmatpush3.bf16.msra.mxu0 %v545_v8  ;;  %532 = vmatpush3.bf16.msra.mxu1 %v545_v8 }
  0x37   :  { %500 = vmatprep.subr.bf16.mxu0 %v546_v9  ;;  %525 = vmatprep.subr.bf16.mxu1 %v546_v9 }
  0x3a   :  { %501 = vmatpush3.bf16.msra.mxu0 %v546_v9  ;;  %533 = vmatpush3.bf16.msra.mxu1 %v546_v9 }
  0x3d   :  { %503 = vmatmul.mubr.bf16.vlgmr.msra.gmra.mxu0 %v549_v10  ;;  %511 = vmatmul.mubr.bf16.vlgmr.msra.gmra.mxu1 %v550_v11 }
  0x3e   :  { %506 = vmatprep.mubr.bf16.mxu0 %v551_v12  ;;  %514 = vmatprep.mubr.bf16.mxu1 %v552_v13 }
  0x45   :  { %507 = vmatmul.mubr.bf16.gmra.mxu0 %v553_v14  ;;  %515 = vmatmul.mubr.bf16.gmra.mxu1 %v554_v15 }
  0xfd   :  { %v504_v16 = vpop.f32.mrf.mxu0  ;;  %v512_v17 = vpop.f32.mrf.mxu1 }
  0xfe   :  { %v222_v23 = vadd.f32 %v504_v16, %v374_v18  ;;  %v254_v24 = vadd.f32 %v512_v17, %v374_v18 }
  0xff   :  { %v213_v19 = vpop.f32.mrf.mxu0  ;;  %v245_v20 = vpop.f32.mrf.mxu1 }
 0x100   :  { %v214_v27 = vadd.f32 %v374_v18, %v213_v19  ;;  %v246_v28 = vadd.f32 %v374_v18, %v245_v20 }
 0x101   :  { %v505_v21 = vpop.f32.mrf.mxu0  ;;  %v513_v22 = vpop.f32.mrf.mxu1 }
 0x102   :  { %v225_v25 = vadd.f32 %v505_v21, %v374_v18  ;;  %v257_v26 = vadd.f32 %v513_v22, %v374_v18 }
 0x103   :  { %v216_v29 = vpop.f32.mrf.mxu0  ;;  %v248_v30 = vpop.f32.mrf.mxu1 }
 0x104   :  { %v431_v31 = vpack.c.bf16 %v225_v25, %v222_v23  ;;  %v451_v32 = vpack.c.bf16 %v257_v26, %v254_v24  ;;  %v217_v33 = vadd.f32 %v374_v18, %v216_v29  ;;  %v249_v34 = vadd.f32 %v374_v18, %v248_v30 }
 0x105   :  { %v508_v35 = vpop.f32.mrf.mxu0  ;;  %v516_v36 = vpop.f32.mrf.mxu1 }
 0x106   :  { %463 = vst [vmem:[#allocation7 + $0x8] sm:$0xff] %v431_v31   ;;  %467 = vst [vmem:[#allocation7 + $0x28] sm:$0xff] %v451_v32   ;;  %v426_v37 = vpack.c.bf16 %v217_v33, %v214_v27  ;;  %v446_v38 = vpack.c.bf16 %v249_v34, %v246_v28  ;;  %v238_v43 = vadd.f32 %v508_v35, %v374_v18 }
 0x107   :  { %v229_v39 = vpop.f32.mrf.mxu0  ;;  %v261_v40 = vpop.f32.mrf.mxu1  ;;  %v270_v44 = vadd.f32 %v516_v36, %v374_v18 }
 0x108   :  { %427 = vst [vmem:[#allocation7] sm:$0xff] %v426_v37   ;;  %466 = vst [vmem:[#allocation7 + $0x20] sm:$0xff] %v446_v38   ;;  %v230_v47 = vadd.f32 %v374_v18, %v229_v39  ;;  %v262_v48 = vadd.f32 %v374_v18, %v261_v40 }
 0x109   :  { %v509_v41 = vpop.f32.mrf.mxu0  ;;  %v517_v42 = vpop.f32.mrf.mxu1 }
 0x10a   :  { %v241_v45 = vadd.f32 %v509_v41, %v374_v18  ;;  %v273_v46 = vadd.f32 %v517_v42, %v374_v18 }
 0x10b   :  { %v232_v49 = vpop.f32.mrf.mxu0  ;;  %v264_v50 = vpop.f32.mrf.mxu1 }
 0x10c   :  { %v441_v51 = vpack.c.bf16 %v241_v45, %v238_v43  ;;  %v461_v52 = vpack.c.bf16 %v273_v46, %v270_v44  ;;  %v233_v53 = vadd.f32 %v374_v18, %v232_v49  ;;  %v265_v54 = vadd.f32 %v374_v18, %v264_v50 }
 0x10e   :  { %465 = vst [vmem:[#allocation7 + $0x18] sm:$0xff] %v441_v51   ;;  %469 = vst [vmem:[#allocation7 + $0x38] sm:$0xff] %v461_v52   ;;  %v436_v55 = vpack.c.bf16 %v233_v53, %v230_v47  ;;  %v456_v56 = vpack.c.bf16 %v265_v54, %v262_v48 }
 0x110   :  { %464 = vst [vmem:[#allocation7 + $0x10] sm:$0xff] %v436_v55   ;;  %468 = vst [vmem:[#allocation7 + $0x30] sm:$0xff] %v456_v56  }
 0x111   :  { %606 = shalt.err (!%p603_p0)
}
 0x112   :  { %367 = dma.vmem_to_hbm [thread:$0]  %s362_s24, 1024, %s670_s3, [#allocation4], %s622_s15, %s622_s15, %s623_s16  }
 0x113   :  { %619 = dma.done.wait [#allocation4], 1024  }
 0x114   :  { %620 = vsyncadd [#allocation4], 4294966272 }
 0x115   :  { %371 = vsyncpa [#allocation3], 1 }
 0x116   :  { %372 = vsyncpa [#allocation6], 1 }
 0x117   :  { %373 = vsyncpa [#allocation4], 1 }

</bundles_post_ra>
